<compile_context>
chip_gen: v5e
topology: v5e:2x2
jax: 0.10.0
libtpu: 0.0.40
codegen_flags: <defaults>
</compile_context>

<pallas_src>
import jax
import jax.numpy as jnp
from jax.experimental import pallas as pl
from jax.experimental.pallas import tpu as pltpu


def _round_up(v, m):
    return ((v + m - 1) // m) * m


def _largest_divisor(n, candidates=(1024, 512, 256, 128)):
    for c in candidates:
        if n % c == 0:
            return c
    return candidates[-1]


def _kernel_f32_out(x_ref, w_ref, b_ref, r_ref, o_ref):
    # out[i, j] = sum_k x[i, k] @ w[k, j] + b[j] + x[i, j]
    # f32 output: the output block is resident across k (its index_map ignores
    # k), so accumulate straight into it — no scratch accumulator needed.
    k = pl.program_id(2)

    @pl.when(k == 0)
    def _():
        o_ref[...] = jnp.zeros_like(o_ref)

    o_ref[...] += jnp.dot(
        x_ref[...].astype(jnp.bfloat16),   # bf16 only for the MXU
        w_ref[...],
        preferred_element_type=jnp.float32,
    )

    @pl.when(k == pl.num_programs(2) - 1)
    def _():
        # bias + full-precision residual, added once at the end.
        o_ref[...] += b_ref[...] + r_ref[...].astype(jnp.float32)


def _kernel_acc_out(x_ref, w_ref, b_ref, r_ref, o_ref, acc_ref):
    # Low-precision output: keep an f32 scratch accumulator, cast at the end.
    k = pl.program_id(2)

    @pl.when(k == 0)
    def _():
        acc_ref[...] = jnp.zeros_like(acc_ref)

    acc_ref[...] += jnp.dot(
        x_ref[...].astype(jnp.bfloat16),
        w_ref[...],
        preferred_element_type=jnp.float32,
    )

    @pl.when(k == pl.num_programs(2) - 1)
    def _():
        o_ref[...] = (
            acc_ref[...] + b_ref[...] + r_ref[...].astype(jnp.float32)
        ).astype(o_ref.dtype)


def residual_add_linear(x, w, b):
    """y = (x @ w + b) + x, x: (B, S, H), w: (H, H), b: (H,)."""
    B, S, H = x.shape
    M = B * S
    out_dtype = x.dtype
    x_isz = jnp.dtype(x.dtype).itemsize
    o_isz = jnp.dtype(out_dtype).itemsize

    # ---- tile plan ---------------------------------------------------------
    Hp = _round_up(H, 128)                       # lane-dense hidden
    if M <= 256:
        # small M: one row block, 16-aligned (bf16 packs 2 rows / sublane)
        TM = _round_up(max(M, 16), 16)
        Mp = TM
    else:
        # pick TM minimizing padding waste, ties broken by the larger tile
        TM = min((1024, 512, 256, 128), key=lambda t: (_round_up(M, t), -t))
        Mp = _round_up(M, TM)
    TK = _largest_divisor(Hp)                    # deep K per dot (<= 1024)
    TN = _largest_divisor(Hp)
    gm = Mp // TM
    if gm == 1 and TN == Hp and Hp >= 256:
        # keep >= 2 blocks on a parallel axis so v7x's 2nd TensorCore works
        TN = _largest_divisor(Hp // 2)
    gn, gk = Hp // TN, Hp // TK

    use_scratch = out_dtype != jnp.float32

    # ---- operand prep (x stays in native dtype; w cast to bf16 once) -------
    x2 = x.reshape(M, H)
    if Mp != M or Hp != H:
        x2 = jnp.pad(x2, ((0, Mp - M), (0, Hp - H)))
    w2 = w.astype(jnp.bfloat16)
    b2 = b.reshape(1, H).astype(jnp.float32)
    if Hp != H:
        w2 = jnp.pad(w2, ((0, Hp - H), (0, Hp - H)))
        b2 = jnp.pad(b2, ((0, 0), (0, Hp - H)))

    # ---- VMEM budget (double-buffered tiles; fits v7x 64 MiB ceiling) ------
    footprint = 2 * (
        TM * TK * x_isz      # x tile (native dtype)
        + TK * TN * 2        # w tile (bf16)
        + TN * 4             # bias tile
        + TM * TN * x_isz    # residual tile
        + TM * TN * o_isz    # output tile
    )
    if use_scratch:
        footprint += TM * TN * 4
    vmem_limit = min(max(32 << 20, footprint + (12 << 20)), 48 << 20)

    # ---- cost estimate: real DMA traffic ------------------------------------
    x_bytes = Mp * Hp * x_isz
    cost = pl.CostEstimate(
        flops=2 * Mp * Hp * Hp,
        transcendentals=0,
        bytes_accessed=(
            gn * x_bytes              # x re-read once per output column block
            + gm * Hp * Hp * 2        # bf16 w re-read once per row block
            + x_bytes                 # residual stream (read once)
            + gm * Hp * 4             # bias
            + Mp * Hp * o_isz         # output write
        ),
    )

    kernel = _kernel_acc_out if use_scratch else _kernel_f32_out
    scratch = [pltpu.VMEM((TM, TN), jnp.float32)] if use_scratch else []

    out = pl.pallas_call(
        kernel,
        out_shape=jax.ShapeDtypeStruct((Mp, Hp), out_dtype),
        grid_spec=pltpu.PrefetchScalarGridSpec(
            num_scalar_prefetch=0,
            grid=(gm, gn, gk),
            in_specs=[
                pl.BlockSpec((TM, TK), lambda i, j, k: (i, k)),  # x tile
                pl.BlockSpec((TK, TN), lambda i, j, k: (k, j)),  # weight tile
                pl.BlockSpec((1, TN), lambda i, j, k: (0, j)),   # bias tile
                pl.BlockSpec((TM, TN), lambda i, j, k: (i, j)),  # residual x
            ],
            out_specs=pl.BlockSpec((TM, TN), lambda i, j, k: (i, j)),
            scratch_shapes=scratch,
        ),
        compiler_params=pltpu.CompilerParams(
            # M, N parallel (pipelining + megacore sharding); K is the
            # innermost reduction axis with an output-resident accumulator.
            dimension_semantics=("parallel", "parallel", "arbitrary"),
            vmem_limit_bytes=vmem_limit,
        ),
        cost_estimate=cost,
    )(x2, w2, b2, x2)

    return out[:M, :H].reshape(B, S, H)


if __name__ == "__main__":
    key = jax.random.PRNGKey(0)
    kx, kw, kb = jax.random.split(key, 3)

    batch, seq, hidden = 2, 8, 32
    x = jax.random.normal(kx, (batch, seq, hidden), dtype=jnp.float32)
    # Deterministic "Linear(hidden, hidden)" params (synthetic init).
    w = jax.random.normal(kw, (hidden, hidden), dtype=jnp.float32) * (1.0 / hidden**0.5)
    b = jax.random.normal(kb, (hidden,), dtype=jnp.float32) * 0.01

    y = residual_add_linear(x, w, b)
    jax.block_until_ready(y)

    # Reference: matmul with the same bf16-rounded operands the MXU sees,
    # but the bias and residual at full precision (matches kernel semantics).
    xb = x.astype(jnp.bfloat16).astype(jnp.float32)
    wb = w.astype(jnp.bfloat16).astype(jnp.float32)
    y_ref = (
        jnp.einsum("bsh,hk->bsk", xb, wb, precision=jax.lax.Precision.HIGHEST)
        + b
        + x
    )
    assert jnp.allclose(y, y_ref, atol=1e-3, rtol=1e-3), "mismatch vs reference"

    print("KERNEL_OK")
</pallas_src>

<mosaic_0001>
module attributes {stable_mosaic.version = 11 : i64} {
  func.func @_kernel_f32_out(%arg0: i32, %arg1: i32, %arg2: i32, %arg3: memref<16x128xf32, #tpu.memory_space<vmem>>, %arg4: memref<128x128xbf16, #tpu.memory_space<vmem>>, %arg5: memref<1x128xf32, #tpu.memory_space<vmem>>, %arg6: memref<16x128xf32, #tpu.memory_space<vmem>>, %arg7: memref<16x128xf32, #tpu.memory_space<vmem>>) attributes {dimension_semantics = [#tpu.dimension_semantics<parallel>, #tpu.dimension_semantics<parallel>, #tpu.dimension_semantics<arbitrary>], iteration_bounds = array<i64: 1, 1, 1>, scalar_prefetch = 0 : i64, scratch_operands = 0 : i64, tpu.core_type = #tpu.core_type<tc>, window_params = [{transform_indices = @transform_0, window_bounds = array<i64: 16, 128>}, {transform_indices = @transform_1, window_bounds = array<i64: 128, 128>}, {transform_indices = @transform_2, window_bounds = array<i64: 1, 128>}, {transform_indices = @transform_3, window_bounds = array<i64: 16, 128>}, {transform_indices = @transform_4, window_bounds = array<i64: 16, 128>}]} {
    %c0_i32 = arith.constant 0 : i32
    %0 = arith.cmpi eq, %arg2, %c0_i32 : i32
    %1 = arith.extui %0 : i1 to i32
    %c0_i32_0 = arith.constant 0 : i32
    %2 = arith.cmpi ne, %1, %c0_i32_0 : i32
    scf.if %2 {
      %cst_10 = arith.constant 0.000000e+00 : f32
      %13 = vector.broadcast %cst_10 : f32 to vector<16x128xf32>
      %c0_11 = arith.constant 0 : index
      %c0_12 = arith.constant 0 : index
      %14 = vector.load %arg7[%c0_11, %c0_12] : memref<16x128xf32, #tpu.memory_space<vmem>>, vector<16x128xf32>
      tpu.vector_store %arg7[%c0_11, %c0_12], %13 {strides = array<i32>} : memref<16x128xf32, #tpu.memory_space<vmem>>, vector<16x128xf32>,
    } else {
    }
    %c0 = arith.constant 0 : index
    %c0_1 = arith.constant 0 : index
    %3 = vector.load %arg7[%c0, %c0_1] : memref<16x128xf32, #tpu.memory_space<vmem>>, vector<16x128xf32>
    %c0_2 = arith.constant 0 : index
    %c0_3 = arith.constant 0 : index
    %4 = vector.load %arg3[%c0_2, %c0_3] : memref<16x128xf32, #tpu.memory_space<vmem>>, vector<16x128xf32>
    %5 = arith.truncf %4 : vector<16x128xf32> to vector<16x128xbf16>
    %c0_4 = arith.constant 0 : index
    %c0_5 = arith.constant 0 : index
    %6 = vector.load %arg4[%c0_4, %c0_5] : memref<128x128xbf16, #tpu.memory_space<vmem>>, vector<128x128xbf16>
    %cst = arith.constant dense<0.000000e+00> : vector<16x128xf32>
    %7 = tpu.matmul %5, %6, %cst {dimension_numbers = #tpu.dot_dimension_numbers<[1], [0], [0], [1], [0, 0, 1, 1], [], []>} : vector<16x128xbf16>, vector<128x128xbf16>, vector<16x128xf32> -> vector<16x128xf32>
    %8 = arith.addf %3, %7 : vector<16x128xf32>
    %c0_6 = arith.constant 0 : index
    %c0_7 = arith.constant 0 : index
    %9 = vector.load %arg7[%c0_6, %c0_7] : memref<16x128xf32, #tpu.memory_space<vmem>>, vector<16x128xf32>
    tpu.vector_store %arg7[%c0_6, %c0_7], %8 {strides = array<i32>} : memref<16x128xf32, #tpu.memory_space<vmem>>, vector<16x128xf32>,
    %c0_i32_8 = arith.constant 0 : i32
    %10 = arith.cmpi eq, %arg2, %c0_i32_8 : i32
    %11 = arith.extui %10 : i1 to i32
    %c0_i32_9 = arith.constant 0 : i32
    %12 = arith.cmpi ne, %11, %c0_i32_9 : i32
    scf.if %12 {
      %c0_10 = arith.constant 0 : index
      %c0_11 = arith.constant 0 : index
      %13 = vector.load %arg7[%c0_10, %c0_11] : memref<16x128xf32, #tpu.memory_space<vmem>>, vector<16x128xf32>
      %c0_12 = arith.constant 0 : index
      %c0_13 = arith.constant 0 : index
      %14 = vector.load %arg5[%c0_12, %c0_13] : memref<1x128xf32, #tpu.memory_space<vmem>>, vector<1x128xf32>
      %c0_14 = arith.constant 0 : index
      %c0_15 = arith.constant 0 : index
      %15 = vector.load %arg6[%c0_14, %c0_15] : memref<16x128xf32, #tpu.memory_space<vmem>>, vector<16x128xf32>
      %16 = vector.broadcast %14 : vector<1x128xf32> to vector<16x128xf32>
      %17 = arith.addf %16, %15 : vector<16x128xf32>
      %18 = arith.addf %13, %17 : vector<16x128xf32>
      %c0_16 = arith.constant 0 : index
      %c0_17 = arith.constant 0 : index
      %19 = vector.load %arg7[%c0_16, %c0_17] : memref<16x128xf32, #tpu.memory_space<vmem>>, vector<16x128xf32>
      tpu.vector_store %arg7[%c0_16, %c0_17], %18 {strides = array<i32>} : memref<16x128xf32, #tpu.memory_space<vmem>>, vector<16x128xf32>,
    } else {
    }
    return
  }
  func.func @transform_0(%arg0: i32, %arg1: i32, %arg2: i32) -> (i32, i32) {
    %c0_i32 = arith.constant 0 : i32
    return %arg0, %arg2 : i32, i32
  }
  func.func @transform_1(%arg0: i32, %arg1: i32, %arg2: i32) -> (i32, i32) {
    %c0_i32 = arith.constant 0 : i32
    return %arg2, %arg1 : i32, i32
  }
  func.func @transform_2(%arg0: i32, %arg1: i32, %arg2: i32) -> (i32, i32) {
    %c0_i32 = arith.constant 0 : i32
    %c0_i32_0 = arith.constant 0 : i32
    return %c0_i32, %arg1 : i32, i32
  }
  func.func @transform_3(%arg0: i32, %arg1: i32, %arg2: i32) -> (i32, i32) {
    %c0_i32 = arith.constant 0 : i32
    return %arg0, %arg1 : i32, i32
  }
  func.func @transform_4(%arg0: i32, %arg1: i32, %arg2: i32) -> (i32, i32) {
    %c0_i32 = arith.constant 0 : i32
    return %arg0, %arg1 : i32, i32
  }
}

</mosaic_0001>

<bundles_post_ra>
// kernel: tpu_custom_call.1
= control target key start
LH: loop header
LB: loop body
LE: loop exit
PB: predicated region body
PF: predicated region fallthrough
CT: control target
= control target key end

     0   :  { %9 = vsyncpa [#allocation3], 0  ;;  %s404_s0 = inlined_call_operand.hbm [shape: f32[16,128], index: 0, kind: input, shape index: {}]   ;;  %s405_s1 = inlined_call_operand.hbm [shape: bf16[128,128], index: 1, kind: input, shape index: {}]   ;;  %s406_s2 = inlined_call_operand.vmem [shape: f32[1,128], index: 2, kind: input, shape index: {}]   ;;  %s407_s3 = inlined_call_operand.hbm [shape: f32[16,128], index: 3, kind: input, shape index: {}]   ;;  %s408_s4 = inlined_call_operand.hbm [shape: f32[16,128], index: 4, kind: output, shape index: {}]  }
   0x1   :  { %10 = vsyncpa [#allocation6], 0  ;;  %s29_s17 = sshll.u32 %s405_s1, 4  ;;  %s30_s17 = int_to_ptr.hbm [resolvable:$true] %s29_s17 }
   0x2   :  { %11 = vsyncpa [#allocation4], 0  ;;  %s347_s18 = smov [#allocation5]   ;;  %s16_s22 = sshll.u32 %s404_s0, 4  ;;  %s17_s22 = int_to_ptr.hbm [resolvable:$true] %s16_s22 }
   0x3   :  { %s31_s19 = sshll.u32 %s347_s18, 4  ;;  %s348_s23 = smov 64   ;;  %s32_s19 = int_to_ptr.vmem [resolvable:$true] %s31_s19 }
   0x4   :  { %s349_s24 = smov 4   ;;  %s350_s25 = smov [#allocation2]  }
   0x5   :  { %37 = dma.hbm_to_vmem [thread:$0]  %s30_s17, 1024, %s32_s19, [#allocation6], %s348_s23, %s348_s23, %s349_s24  }
   0x6   :  { %s18_s26 = sshll.u32 %s350_s25, 4  ;;  %s351_s27 = smov 128   ;;  %s19_s26 = int_to_ptr.vmem [resolvable:$true] %s18_s26 }
   0x7   :  { %s352_s28 = smov 8   ;;  %s44_s30 = sshll.u32 %s407_s3, 4  ;;  %s45_s30 = int_to_ptr.hbm [resolvable:$true] %s44_s30 }
   0x8   :  { %24 = dma.hbm_to_vmem [thread:$0]  %s17_s22, 256, %s19_s26, [#allocation3], %s351_s27, %s351_s27, %s352_s28  }
   0x9   :  { %s353_s5 = smov [#allocation7]  }
   0xa   :  { %s46_s0 = sshll.u32 %s353_s5, 4  ;;  %s47_s0 = int_to_ptr.vmem [resolvable:$true] %s46_s0 }
   0xb   :  { %52 = dma.hbm_to_vmem [thread:$0]  %s45_s30, 256, %s47_s0, [#allocation6], %s351_s27, %s351_s27, %s352_s28  }
   0xc   :  { %341 = dma.done.wait [#allocation3], 256  }
   0xd   :  { %342 = vsyncadd [#allocation3], 4294967040 }
   0xe   :  { %343 = dma.done.wait [#allocation6], 1280  }
   0xf   :  { %344 = vsyncadd [#allocation6], 4294966016  ;;  %v234_v0 = vld [vmem:[#allocation5 + $0x38] sm:$0xff]  ;;  %v233_v1 = vld [vmem:[#allocation5 + $0x30] sm:$0xff]  ;;  %s354_s7 = smov [#allocation8]   ;;  %s181_s11 = sshll.u32 %s408_s4, 4  ;;  %s182_s11 = int_to_ptr.hbm [resolvable:$true] %s181_s11 }
  0x10   :  { %140 = vmatpush.bf16.msra.mxu0 %v234_v0  ;;  %v232_v2 = vld [vmem:[#allocation5 + $0x28] sm:$0xff]  ;;  %v231_v3 = vld [vmem:[#allocation5 + $0x20] sm:$0xff]  ;;  %v230_v4 = vld [vmem:[#allocation5 + $0x18] sm:$0xff]  ;;  %s179_s8 = sshll.u32 %s354_s7, 4  ;;  %s180_s8 = int_to_ptr.vmem [resolvable:$true] %s179_s8 }
  0x11   :  { %v229_v5 = vld [vmem:[#allocation5 + $0x10] sm:$0xff]  ;;  %v228_v6 = vld [vmem:[#allocation5 + $0x8] sm:$0xff]  ;;  %v227_v7 = vld [vmem:[#allocation5] sm:$0xff] }
  0x12   :  { %v73_v8 = vld [vmem:[#allocation2] sm:$0xff]  ;;  %v74_v9 = vld [vmem:[#allocation2 + $0x8] sm:$0xff]  ;;  %v164_v12 = vld [vmem:[#allocation7] sm:$0xff] }
  0x13   :  { %v75_v10 = vpack.c.bf16 %v74_v9, %v73_v8  ;;  %v244_v11 = vld [vmem:[%s406_s2] ss:$0 sm:$0xff]  ;;  %v165_v16 = vld [vmem:[#allocation7 + $0x8] sm:$0xff] }
  0x14   :  { %141 = vmatpush.bf16.msra.mxu0 %v233_v1  ;;  %v169_v13 = vadd.f32 %v244_v11, %v164_v12  ;;  %v170_v17 = vadd.f32 %v244_v11, %v165_v16 }
  0x18   :  { %142 = vmatpush.bf16.msra.mxu0 %v232_v2 }
  0x1c   :  { %143 = vmatpush.bf16.msra.mxu0 %v231_v3 }
  0x20   :  { %144 = vmatpush.bf16.msra.mxu0 %v230_v4 }
  0x24   :  { %145 = vmatpush.bf16.msra.mxu0 %v229_v5 }
  0x28   :  { %146 = vmatpush.bf16.msra.mxu0 %v228_v6 }
  0x2c   :  { %147 = vmatpush.bf16.msra.mxu0 %v227_v7 }
  0x2f   :  { %148 = vmatmul.bf16.vlgmr.msra.gmra.mxu0 %v75_v10 }
  0xac   :  { %v149_v14 = vpop.f32.mrf.mxu0 }
  0xad   :  { %v171_v15 = vadd.f32 %v169_v13, %v149_v14 }
  0xaf   :  { %173 = vst [vmem:[#allocation8] sm:$0xff] %v171_v15 }
  0xb4   :  { %v151_v18 = vpop.f32.mrf.mxu0 }
  0xb5   :  { %v172_v19 = vadd.f32 %v170_v17, %v151_v18 }
  0xb7   :  { %174 = vst [vmem:[#allocation8 + $0x8] sm:$0xff] %v172_v19 }
  0xb8   :  { %187 = dma.vmem_to_hbm [thread:$0]  %s180_s8, 256, %s182_s11, [#allocation4], %s351_s27, %s351_s27, %s352_s28  }
  0xb9   :  { %345 = dma.done.wait [#allocation4], 256  }
  0xba   :  { %346 = vsyncadd [#allocation4], 4294967040 }
  0xbb   :  { %192 = vsyncpa [#allocation3], 1 }
  0xbc   :  { %193 = vsyncpa [#allocation6], 1 }
  0xbd   :  { %194 = vsyncpa [#allocation4], 1 }

</bundles_post_ra>
